<compile_context>
chip_gen: v7x
topology: tpu7x:2x2x1
jax: 0.10.0
libtpu: 0.0.40
codegen_flags: <defaults>
</compile_context>

<pallas_src>
import jax
import jax.numpy as jnp
from jax.experimental import pallas as pl
from jax.experimental.pallas import tpu as pltpu


def _round_up(x, m):
    return (x + m - 1) // m * m


def _sublane_multiple(dtype):
    # f32 -> 8 rows per vreg, bf16 -> 16 (packed pairs), 8-bit -> 32.
    return max(8, 32 // max(1, jnp.dtype(dtype).itemsize))


def _vmem_capacity_bytes():
    try:
        return int(pltpu.get_tpu_info().vmem_capacity_bytes)
    except Exception:
        return 64 * 2**20  # conservative default: v7x per-TensorCore VMEM


# --------------------------------------------------------------------------- #
# Kernels
# --------------------------------------------------------------------------- #
def _mlp_resident_kernel(x_ref, w1_ref, b1_ref, w2_ref, b2_ref, o_ref):
    """Both weight matrices VMEM-resident; one row tile per grid step."""
    h = jnp.dot(x_ref[...], w1_ref[...], preferred_element_type=jnp.float32)
    h = jnp.maximum(h + b1_ref[...], 0.0)
    # Hidden activation cast to the weight dtype (bf16 in bf16-compute mode);
    # accumulation stays f32.
    y = jnp.dot(h.astype(w2_ref.dtype), w2_ref[...],
                preferred_element_type=jnp.float32)
    o_ref[...] = (y + b2_ref[...]).astype(o_ref.dtype)


def _mlp_hidden_tiled_kernel(x_ref, w1_ref, b1_ref, w2_ref, b2_ref, o_ref,
                             acc_ref):
    """Hidden-dim tiled variant: grid=(rows, hidden); f32 accumulator scratch.

    Valid because relu / b1 are elementwise per hidden column, so the second
    matmul decomposes as a sum over hidden tiles.
    """
    hk = pl.program_id(1)

    @pl.when(hk == 0)
    def _():
        acc_ref[...] = jnp.zeros_like(acc_ref)

    h = jnp.dot(x_ref[...], w1_ref[...], preferred_element_type=jnp.float32)
    h = jnp.maximum(h + b1_ref[...], 0.0)
    acc_ref[...] += jnp.dot(h.astype(w2_ref.dtype), w2_ref[...],
                            preferred_element_type=jnp.float32)

    @pl.when(hk == pl.num_programs(1) - 1)
    def _():
        o_ref[...] = (acc_ref[...] + b2_ref[...]).astype(o_ref.dtype)


# --------------------------------------------------------------------------- #
# Wrapper
# --------------------------------------------------------------------------- #
def gatcadnet_mlp(x, w1, b1, w2, b2, *, tile_rows=None, hidden_tile=None,
                  compute_dtype=jnp.bfloat16):
    """GATCADNetMLP forward: linear2(relu(linear1(x))) over the last dim.

    x : (..., c_in)          arbitrary leading dims (flattened to rows)
    w1: (c_in, c_in)         linear1.weight pre-transposed to (in, out)
    b1: (c_in,)
    w2: (c_in, c_out)        linear2.weight pre-transposed to (in, out)
    b2: (c_out,)

    compute_dtype : dtype used for x / W1 / W2 on the MXU (default bfloat16;
        accumulation and biases stay f32).  Pre-cast the weights once outside
        the call so the .astype here is a no-op.
    hidden_tile   : force the hidden-dim-tiled path with this tile width
        (multiple of 128 that divides c_in).  Auto-selected when the weights
        cannot stay VMEM-resident.
    """
    *lead, c_in = x.shape
    c_out = w2.shape[1]
    assert w1.shape == (c_in, c_in) and w2.shape[0] == c_in

    out_dtype = x.dtype
    cdt = jnp.dtype(compute_dtype)
    bpe = cdt.itemsize
    obpe = jnp.dtype(out_dtype).itemsize
    sub = max(_sublane_multiple(cdt), _sublane_multiple(out_dtype))

    n = 1
    for d in lead:
        n *= d

    # Cast once (no-op if already in compute dtype); no feature padding — the
    # full-dim lane-block exception handles c_in / c_out that aren't 128-aligned
    # and avoids an extra HBM pass over x, W1, W2 and the output.
    x2 = x.reshape(n, c_in).astype(cdt)
    w1c = w1.astype(cdt)
    w2c = w2.astype(cdt)
    b1f = b1.reshape(1, c_in).astype(jnp.float32)
    b2f = b2.reshape(1, c_out).astype(jnp.float32)

    # Rows only padded up to the sublane multiple when misaligned (cheap; keeps
    # every block within array bounds and vreg-packing-friendly).
    n_pad = _round_up(n, sub)
    if n_pad != n:
        x2 = jnp.pad(x2, ((0, n_pad - n), (0, 0)))

    # ---- row tile: target ~2 MiB of x per grid step ---------------------------
    if tile_rows is None:
        tr = max(256, (2 * 2**20) // max(1, c_in * bpe))
    else:
        tr = int(tile_rows)
    tr = max(sub, _round_up(tr, sub))
    tr = min(tr, n_pad)

    # ---- VMEM budget: ~75% of per-core capacity (≈48 MiB v7x, ≈96 MiB v6e) ----
    budget = int(0.75 * _vmem_capacity_bytes())
    weight_bytes = (c_in * c_in + c_in * c_out) * bpe      # single-buffered

    def _step_bytes(t):
        return (2 * t * c_in * bpe          # x tile (double-buffered)
                + 2 * t * c_out * obpe      # out tile (double-buffered)
                + t * (c_in + c_out) * 4    # f32 intermediates
                + 4 * (c_in + c_out))       # biases

    use_hidden = hidden_tile is not None
    if (not use_hidden and c_in % 128 == 0 and c_in > 128
            and weight_bytes + _step_bytes(sub) > budget):
        use_hidden = True   # resident weights can't fit (large c_in, v7x VMEM)
    # TODO(synk): very large c_in that is NOT a multiple of 128 still uses the
    #             resident path and may exceed VMEM; would need padded hidden
    #             tiling in that case.

    if not use_hidden:
        # Shrink the row tile until resident weights + per-step buffers fit.
        while tr > sub and weight_bytes + _step_bytes(tr) > budget:
            tr = max(sub, _round_up(tr // 2, sub))
        grid_rows = pl.cdiv(n_pad, tr)

        def build(single_buffer_weights):
            wf = 1 if single_buffer_weights else 2
            est = wf * weight_bytes + _step_bytes(tr)
            vmem_limit = int(min(max(est + est // 4 + (4 << 20), 16 * 2**20),
                                 budget))
            wkw = ({"pipeline_mode": pl.Buffered(1)}
                   if single_buffer_weights else {})
            return pl.pallas_call(
                _mlp_resident_kernel,
                out_shape=jax.ShapeDtypeStruct((n_pad, c_out), out_dtype),
                grid_spec=pltpu.PrefetchScalarGridSpec(
                    num_scalar_prefetch=0,
                    grid=(grid_rows,),
                    in_specs=[
                        pl.BlockSpec((tr, c_in), lambda i: (i, 0)),
                        # Loop-invariant operands: constant block index keeps
                        # them VMEM-resident; single-buffered when supported.
                        pl.BlockSpec((c_in, c_in), lambda i: (0, 0), **wkw),
                        pl.BlockSpec((1, c_in), lambda i: (0, 0), **wkw),
                        pl.BlockSpec((c_in, c_out), lambda i: (0, 0), **wkw),
                        pl.BlockSpec((1, c_out), lambda i: (0, 0), **wkw),
                    ],
                    out_specs=pl.BlockSpec((tr, c_out), lambda i: (i, 0)),
                ),
                compiler_params=pltpu.CompilerParams(
                    # "parallel" lets v7x shard the row grid across its 2 TCs
                    # (each TC then holds its own resident copy of W1/W2).
                    dimension_semantics=("parallel",),
                    vmem_limit_bytes=vmem_limit,
                ),
            )

        args = (x2, w1c, b1f, w2c, b2f)
        try:
            out = build(True)(*args)
        except Exception:
            # Fallback if this JAX build rejects pl.Buffered(1): default
            # double-buffered weights (correct, just 2x weight VMEM).
            out = build(False)(*args)
    else:
        if hidden_tile is not None:
            th = int(hidden_tile)
            if th % 128 != 0 or c_in % th != 0:
                raise ValueError(
                    "hidden_tile must be a multiple of 128 that divides c_in")
        else:
            th = 256 if c_in % 256 == 0 else 128

        def _hidden_step_bytes(t):
            return (2 * (c_in * th + th * c_out) * bpe   # W1/W2 tiles, dbl-buf
                    + 2 * t * c_in * bpe                 # x tile
                    + 2 * t * c_out * obpe               # out tile
                    + t * c_out * 4                      # f32 accumulator
                    + t * th * 4                         # f32 hidden tile
                    + 4 * (c_in + c_out))                # biases

        while tr > sub and _hidden_step_bytes(tr) > budget:
            tr = max(sub, _round_up(tr // 2, sub))
        grid_rows = pl.cdiv(n_pad, tr)
        est = _hidden_step_bytes(tr)
        vmem_limit = int(min(max(est + est // 4 + (4 << 20), 16 * 2**20),
                             budget))
        # TODO(synk): if even tile_h=128 double-buffered overflows the budget
        #             (c_in / c_out in the tens of thousands), tile c_out too.
        out = pl.pallas_call(
            _mlp_hidden_tiled_kernel,
            out_shape=jax.ShapeDtypeStruct((n_pad, c_out), out_dtype),
            grid_spec=pltpu.PrefetchScalarGridSpec(
                num_scalar_prefetch=0,
                grid=(grid_rows, c_in // th),
                in_specs=[
                    pl.BlockSpec((tr, c_in), lambda i, h: (i, 0)),
                    pl.BlockSpec((c_in, th), lambda i, h: (0, h)),
                    pl.BlockSpec((1, th), lambda i, h: (0, h)),
                    pl.BlockSpec((th, c_out), lambda i, h: (h, 0)),
                    pl.BlockSpec((1, c_out), lambda i, h: (0, 0)),
                ],
                out_specs=pl.BlockSpec((tr, c_out), lambda i, h: (i, 0)),
                scratch_shapes=[pltpu.VMEM((tr, c_out), jnp.float32)],
            ),
            compiler_params=pltpu.CompilerParams(
                dimension_semantics=("parallel", "arbitrary"),
                vmem_limit_bytes=vmem_limit,
            ),
        )(x2, w1c, b1f, w2c, b2f)

    if n_pad != n:
        out = out[:n]
    return out.reshape(*lead, c_out)


# --------------------------------------------------------------------------- #
# Params / reference
# --------------------------------------------------------------------------- #
def init_params(key, in_channels, out_channels, dtype=jnp.float32):
    """PyTorch-Linear-style uniform init; weights stored transposed (in, out)."""
    k1, k2, k3, k4 = jax.random.split(key, 4)
    bound = 1.0 / (in_channels ** 0.5)
    w1 = jax.random.uniform(k1, (in_channels, in_channels), dtype,
                            minval=-bound, maxval=bound)
    b1 = jax.random.uniform(k2, (in_channels,), dtype, minval=-bound, maxval=bound)
    w2 = jax.random.uniform(k3, (in_channels, out_channels), dtype,
                            minval=-bound, maxval=bound)
    b2 = jax.random.uniform(k4, (out_channels,), dtype, minval=-bound, maxval=bound)
    return w1, b1, w2, b2


def _ref_mlp(x, w1, b1, w2, b2):
    h = jnp.maximum(jnp.dot(x, w1, precision="highest") + b1, 0.0)
    return jnp.dot(h, w2, precision="highest") + b2


if __name__ == "__main__":
    key = jax.random.PRNGKey(0)
    kx1, kx2, kx3, kp1, kp2 = jax.random.split(key, 5)

    # --- GATCADNetMLP: 32 -> 32 -> 16 on a (2, 24, 32) input ---------------------
    IN_CH, OUT_CH = 32, 16
    w1, b1, w2, b2 = init_params(kp1, IN_CH, OUT_CH)
    # Hoist the compute-dtype cast out of the per-call path (done once here).
    w1_bf, w2_bf = w1.astype(jnp.bfloat16), w2.astype(jnp.bfloat16)

    x = jax.random.normal(kx1, (2, 24, IN_CH), jnp.float32)
    ref = _ref_mlp(x, w1, b1, w2, b2)

    # Default path: bf16 compute, f32 accumulation / biases, resident weights.
    out = jax.block_until_ready(gatcadnet_mlp(x, w1_bf, b1, w2_bf, b2))
    assert out.shape == (2, 24, OUT_CH) and out.dtype == x.dtype
    assert jnp.allclose(out, ref, atol=5e-2, rtol=5e-2)

    # Full-f32 compute path (tighter numerical check of the kernel math).
    out_f32 = jax.block_until_ready(
        gatcadnet_mlp(x, w1, b1, w2, b2, compute_dtype=jnp.float32))
    assert jnp.allclose(out_f32, ref, atol=1e-3, rtol=1e-3)

    # Row count misaligned to the bf16 sublane multiple -> pad-to-16 + slice path.
    x_odd = jax.random.normal(kx2, (42, IN_CH), jnp.float32)
    out_odd = jax.block_until_ready(gatcadnet_mlp(x_odd, w1_bf, b1, w2_bf, b2))
    ref_odd = _ref_mlp(x_odd, w1, b1, w2, b2)
    assert out_odd.shape == (42, OUT_CH)
    assert jnp.allclose(out_odd, ref_odd, atol=5e-2, rtol=5e-2)

    # Hidden-dim-tiled accumulator path (the big-c_in / v7x strategy), forced
    # small here so it is exercised and checked for correctness.
    IN2, OUT2 = 256, 64
    w1b, b1b, w2b, b2b = init_params(kp2, IN2, OUT2)
    xb = jax.random.normal(kx3, (2, 8, IN2), jnp.float32)
    out_h = jax.block_until_ready(
        gatcadnet_mlp(xb, w1b, b1b, w2b, b2b, hidden_tile=128))
    ref_h = _ref_mlp(xb, w1b, b1b, w2b, b2b)
    assert out_h.shape == (2, 8, OUT2)
    assert jnp.allclose(out_h, ref_h, atol=5e-2, rtol=5e-2)

    print("KERNEL_OK")
</pallas_src>

<mosaic_0001>
module attributes {stable_mosaic.version = 11 : i64} {
  func.func @_mlp_resident_kernel(%arg0: i32, %arg1: memref<48x32xbf16, #tpu.memory_space<vmem>>, %arg2: memref<32x32xbf16, #tpu.memory_space<vmem>>, %arg3: memref<1x32xf32, #tpu.memory_space<vmem>>, %arg4: memref<32x16xbf16, #tpu.memory_space<vmem>>, %arg5: memref<1x16xf32, #tpu.memory_space<vmem>>, %arg6: memref<48x16xf32, #tpu.memory_space<vmem>>) attributes {dimension_semantics = [#tpu.dimension_semantics<parallel>], iteration_bounds = array<i64: 1>, scalar_prefetch = 0 : i64, scratch_operands = 0 : i64, tpu.core_type = #tpu.core_type<tc>, window_params = [{transform_indices = @transform_0, window_bounds = array<i64: 48, 32>}, {pipeline_mode = #tpu.pipeline_mode<synchronous>, transform_indices = @transform_1, window_bounds = array<i64: 32, 32>}, {pipeline_mode = #tpu.pipeline_mode<synchronous>, transform_indices = @transform_2, window_bounds = array<i64: 1, 32>}, {pipeline_mode = #tpu.pipeline_mode<synchronous>, transform_indices = @transform_3, window_bounds = array<i64: 32, 16>}, {pipeline_mode = #tpu.pipeline_mode<synchronous>, transform_indices = @transform_4, window_bounds = array<i64: 1, 16>}, {transform_indices = @transform_5, window_bounds = array<i64: 48, 16>}]} {
    %c0 = arith.constant 0 : index
    %c0_0 = arith.constant 0 : index
    %0 = vector.load %arg1[%c0, %c0_0] : memref<48x32xbf16, #tpu.memory_space<vmem>>, vector<48x32xbf16>
    %c0_1 = arith.constant 0 : index
    %c0_2 = arith.constant 0 : index
    %1 = vector.load %arg2[%c0_1, %c0_2] : memref<32x32xbf16, #tpu.memory_space<vmem>>, vector<32x32xbf16>
    %cst = arith.constant dense<0.000000e+00> : vector<48x32xf32>
    %2 = tpu.matmul %0, %1, %cst {dimension_numbers = #tpu.dot_dimension_numbers<[1], [0], [0], [1], [0, 0, 1, 1], [], []>} : vector<48x32xbf16>, vector<32x32xbf16>, vector<48x32xf32> -> vector<48x32xf32>
    %c0_3 = arith.constant 0 : index
    %c0_4 = arith.constant 0 : index
    %3 = vector.load %arg3[%c0_3, %c0_4] : memref<1x32xf32, #tpu.memory_space<vmem>>, vector<1x32xf32>
    %4 = vector.broadcast %3 : vector<1x32xf32> to vector<48x32xf32>
    %5 = arith.addf %2, %4 : vector<48x32xf32>
    %cst_5 = arith.constant 0.000000e+00 : f32
    %6 = vector.broadcast %cst_5 : f32 to vector<48x32xf32>
    %7 = arith.maximumf %5, %6 : vector<48x32xf32>
    %8 = arith.truncf %7 : vector<48x32xf32> to vector<48x32xbf16>
    %c0_6 = arith.constant 0 : index
    %c0_7 = arith.constant 0 : index
    %9 = vector.load %arg4[%c0_6, %c0_7] : memref<32x16xbf16, #tpu.memory_space<vmem>>, vector<32x16xbf16>
    %cst_8 = arith.constant dense<0.000000e+00> : vector<48x16xf32>
    %10 = tpu.matmul %8, %9, %cst_8 {dimension_numbers = #tpu.dot_dimension_numbers<[1], [0], [0], [1], [0, 0, 1, 1], [], []>} : vector<48x32xbf16>, vector<32x16xbf16>, vector<48x16xf32> -> vector<48x16xf32>
    %c0_9 = arith.constant 0 : index
    %c0_10 = arith.constant 0 : index
    %11 = vector.load %arg5[%c0_9, %c0_10] : memref<1x16xf32, #tpu.memory_space<vmem>>, vector<1x16xf32>
    %12 = vector.broadcast %11 : vector<1x16xf32> to vector<48x16xf32>
    %13 = arith.addf %10, %12 : vector<48x16xf32>
    %c0_11 = arith.constant 0 : index
    %c0_12 = arith.constant 0 : index
    %14 = vector.load %arg6[%c0_11, %c0_12] : memref<48x16xf32, #tpu.memory_space<vmem>>, vector<48x16xf32>
    tpu.vector_store %arg6[%c0_11, %c0_12], %13 {strides = array<i32>} : memref<48x16xf32, #tpu.memory_space<vmem>>, vector<48x16xf32>,
    return
  }
  func.func @transform_0(%arg0: i32) -> (i32, i32) {
    %c0_i32 = arith.constant 0 : i32
    %c0_i32_0 = arith.constant 0 : i32
    return %arg0, %c0_i32 : i32, i32
  }
  func.func @transform_1(%arg0: i32) -> (i32, i32) {
    %c0_i32 = arith.constant 0 : i32
    %c0_i32_0 = arith.constant 0 : i32
    %c0_i32_1 = arith.constant 0 : i32
    return %c0_i32, %c0_i32_0 : i32, i32
  }
  func.func @transform_2(%arg0: i32) -> (i32, i32) {
    %c0_i32 = arith.constant 0 : i32
    %c0_i32_0 = arith.constant 0 : i32
    %c0_i32_1 = arith.constant 0 : i32
    return %c0_i32, %c0_i32_0 : i32, i32
  }
  func.func @transform_3(%arg0: i32) -> (i32, i32) {
    %c0_i32 = arith.constant 0 : i32
    %c0_i32_0 = arith.constant 0 : i32
    %c0_i32_1 = arith.constant 0 : i32
    return %c0_i32, %c0_i32_0 : i32, i32
  }
  func.func @transform_4(%arg0: i32) -> (i32, i32) {
    %c0_i32 = arith.constant 0 : i32
    %c0_i32_0 = arith.constant 0 : i32
    %c0_i32_1 = arith.constant 0 : i32
    return %c0_i32, %c0_i32_0 : i32, i32
  }
  func.func @transform_5(%arg0: i32) -> (i32, i32) {
    %c0_i32 = arith.constant 0 : i32
    %c0_i32_0 = arith.constant 0 : i32
    return %arg0, %c0_i32 : i32, i32
  }
}

module attributes {stable_mosaic.version = 11 : i64} {
  func.func @_mlp_resident_kernel(%arg0: i32, %arg1: memref<48x32xbf16, #tpu.memory_space<vmem>>, %arg2: memref<32x32xbf16, #tpu.memory_space<vmem>>, %arg3: memref<1x32xf32, #tpu.memory_space<vmem>>, %arg4: memref<32x16xbf16, #tpu.memory_space<vmem>>, %arg5: memref<1x16xf32, #tpu.memory_space<vmem>>, %arg6: memref<48x16xf32, #tpu.memory_space<vmem>>) attributes {dimension_semantics = [#tpu.dimension_semantics<parallel>], iteration_bounds = array<i64: 1>, scalar_prefetch = 0 : i64, scratch_operands = 0 : i64, tpu.core_type = #tpu.core_type<tc>, window_params = [{transform_indices = @transform_0, window_bounds = array<i64: 48, 32>}, {pipeline_mode = #tpu.pipeline_mode<synchronous>, transform_indices = @transform_1, window_bounds = array<i64: 32, 32>}, {pipeline_mode = #tpu.pipeline_mode<synchronous>, transform_indices = @transform_2, window_bounds = array<i64: 1, 32>}, {pipeline_mode = #tpu.pipeline_mode<synchronous>, transform_indices = @transform_3, window_bounds = array<i64: 32, 16>}, {pipeline_mode = #tpu.pipeline_mode<synchronous>, transform_indices = @transform_4, window_bounds = array<i64: 1, 16>}, {transform_indices = @transform_5, window_bounds = array<i64: 48, 16>}]} {
    %c0 = arith.constant 0 : index
    %c0_0 = arith.constant 0 : index
    %0 = vector.load %arg1[%c0, %c0_0] : memref<48x32xbf16, #tpu.memory_space<vmem>>, vector<48x32xbf16>
    %c0_1 = arith.constant 0 : index
    %c0_2 = arith.constant 0 : index
    %1 = vector.load %arg2[%c0_1, %c0_2] : memref<32x32xbf16, #tpu.memory_space<vmem>>, vector<32x32xbf16>
    %cst = arith.constant dense<0.000000e+00> : vector<48x32xf32>
    %2 = tpu.matmul %0, %1, %cst {dimension_numbers = #tpu.dot_dimension_numbers<[1], [0], [0], [1], [0, 0, 1, 1], [], []>} : vector<48x32xbf16>, vector<32x32xbf16>, vector<48x32xf32> -> vector<48x32xf32>
    %c0_3 = arith.constant 0 : index
    %c0_4 = arith.constant 0 : index
    %3 = vector.load %arg3[%c0_3, %c0_4] : memref<1x32xf32, #tpu.memory_space<vmem>>, vector<1x32xf32>
    %4 = vector.broadcast %3 : vector<1x32xf32> to vector<48x32xf32>
    %5 = arith.addf %2, %4 : vector<48x32xf32>
    %cst_5 = arith.constant 0.000000e+00 : f32
    %6 = vector.broadcast %cst_5 : f32 to vector<48x32xf32>
    %7 = arith.maximumf %5, %6 : vector<48x32xf32>
    %8 = arith.truncf %7 : vector<48x32xf32> to vector<48x32xbf16>
    %c0_6 = arith.constant 0 : index
    %c0_7 = arith.constant 0 : index
    %9 = vector.load %arg4[%c0_6, %c0_7] : memref<32x16xbf16, #tpu.memory_space<vmem>>, vector<32x16xbf16>
    %cst_8 = arith.constant dense<0.000000e+00> : vector<48x16xf32>
    %10 = tpu.matmul %8, %9, %cst_8 {dimension_numbers = #tpu.dot_dimension_numbers<[1], [0], [0], [1], [0, 0, 1, 1], [], []>} : vector<48x32xbf16>, vector<32x16xbf16>, vector<48x16xf32> -> vector<48x16xf32>
    %c0_9 = arith.constant 0 : index
    %c0_10 = arith.constant 0 : index
    %11 = vector.load %arg5[%c0_9, %c0_10] : memref<1x16xf32, #tpu.memory_space<vmem>>, vector<1x16xf32>
    %12 = vector.broadcast %11 : vector<1x16xf32> to vector<48x16xf32>
    %13 = arith.addf %10, %12 : vector<48x16xf32>
    %c0_11 = arith.constant 0 : index
    %c0_12 = arith.constant 0 : index
    %14 = vector.load %arg6[%c0_11, %c0_12] : memref<48x16xf32, #tpu.memory_space<vmem>>, vector<48x16xf32>
    tpu.vector_store %arg6[%c0_11, %c0_12], %13 {strides = array<i32>} : memref<48x16xf32, #tpu.memory_space<vmem>>, vector<48x16xf32>,
    return
  }
  func.func @transform_0(%arg0: i32) -> (i32, i32) {
    %c0_i32 = arith.constant 0 : i32
    %c0_i32_0 = arith.constant 0 : i32
    return %arg0, %c0_i32 : i32, i32
  }
  func.func @transform_1(%arg0: i32) -> (i32, i32) {
    %c0_i32 = arith.constant 0 : i32
    %c0_i32_0 = arith.constant 0 : i32
    %c0_i32_1 = arith.constant 0 : i32
    return %c0_i32, %c0_i32_0 : i32, i32
  }
  func.func @transform_2(%arg0: i32) -> (i32, i32) {
    %c0_i32 = arith.constant 0 : i32
    %c0_i32_0 = arith.constant 0 : i32
    %c0_i32_1 = arith.constant 0 : i32
    return %c0_i32, %c0_i32_0 : i32, i32
  }
  func.func @transform_3(%arg0: i32) -> (i32, i32) {
    %c0_i32 = arith.constant 0 : i32
    %c0_i32_0 = arith.constant 0 : i32
    %c0_i32_1 = arith.constant 0 : i32
    return %c0_i32, %c0_i32_0 : i32, i32
  }
  func.func @transform_4(%arg0: i32) -> (i32, i32) {
    %c0_i32 = arith.constant 0 : i32
    %c0_i32_0 = arith.constant 0 : i32
    %c0_i32_1 = arith.constant 0 : i32
    return %c0_i32, %c0_i32_0 : i32, i32
  }
  func.func @transform_5(%arg0: i32) -> (i32, i32) {
    %c0_i32 = arith.constant 0 : i32
    %c0_i32_0 = arith.constant 0 : i32
    return %arg0, %c0_i32 : i32, i32
  }
}

</mosaic_0001>

<bundles_post_ra>
// kernel: tpu_custom_call.1
= control target key start
LH: loop header
LB: loop body
LE: loop exit
PB: predicated region body
PF: predicated region fallthrough
CT: control target
= control target key end

     0   :  { %v307_v0 = vmov 0.0   ;;  %vm308_vm0 = vmmov 0   ;;  %vm65_vm1 = vcmask 261120   ;;  %vm230_vm2 = vcmask 130048   ;;  %s402_s1 = inlined_call_operand.vmem [shape: bf16[32,32], index: 1, kind: input, shape index: {}]   ;;  %s403_s0 = inlined_call_operand.vmem [shape: bf16[48,32], index: 0, kind: input, shape index: {}]   ;;  %s404_s3 = inlined_call_operand.vmem [shape: bf16[32,16], index: 3, kind: input, shape index: {}]   ;;  %s405_s2 = inlined_call_operand.vmem [shape: f32[1,32], index: 2, kind: input, shape index: {}]   ;;  %s406_s4 = inlined_call_operand.vmem [shape: f32[1,16], index: 4, kind: input, shape index: {}]   ;;  %s407_s5 = inlined_call_operand.vmem [shape: f32[48,16], index: 5, kind: output, shape index: {}]  }
   0x1   :  { %266 = vmatprep.subr.bf16.mxu0 %v307_v0  ;;  %v300_v1 = vld [vmem:[%s402_s1] sm:$0xff]   ;;  %270 = vmatprep.mubr.msk.bf16.mxu0 %vm308_vm0, %v307_v0  ;;  %v301_v2 = vld [vmem:[%s402_s1 + $0x8] sm:$0xff]   ;;  %v304_v5 = vld [vmem:[%s403_s0 + $0x10] sm:$0xff]  }
   0x2   :  { %282 = vmatprep.subr.bf16.mxu1 %v307_v0  ;;  %286 = vmatprep.mubr.msk.bf16.mxu1 %vm308_vm0, %v307_v0  ;;  %v302_v3 = vld [vmem:[%s403_s0] sm:$0xff]   ;;  %v303_v4 = vld [vmem:[%s403_s0 + $0x8] sm:$0xff]  }
   0x3   :  { %267 = vmatpush3.bf16.msra.mxu0 %v300_v1  ;;  %v305_v6 = vld [vmem:[%s404_s3] sm:$0xff]   ;;  %v306_v7 = vld [vmem:[%s404_s3 + $0x8] sm:$0xff]  }
   0x4   :  { %268 = vmatprep.subr.bf16.mxu0 %v307_v0  ;;  %283 = vmatpush3.bf16.msra.mxu1 %v305_v6  ;;  %v241_v8 = vld [vmem:[%s405_s2] ss:$0 sm:$0xff] }
   0x5   :  { %284 = vmatprep.subr.bf16.mxu1 %v307_v0  ;;  %v250_v36 = vld [vmem:[%s406_s4] ss:$0 sm:$0xff] }
   0x7   :  { %269 = vmatpush3.bf16.msra.mxu0 %v301_v2 }
   0x8   :  { %285 = vmatpush3.bf16.msra.mxu1 %v306_v7 }
   0xa   :  { %271 = vmatmul.mubr.msk.bf16.vlgmr.msra.gmra.mrb[0].mxu0 %vm65_vm1, %v302_v3 }
   0xb   :  { %274 = vmatprep.mubr.msk.bf16.mxu0 %vm308_vm0, %v307_v0 }
  0x12   :  { %275 = vmatmul.mubr.msk.bf16.gmra.mrb[4].mxu0 %vm65_vm1, %v303_v4 }
  0x13   :  { %278 = vmatprep.mubr.msk.bf16.mxu0 %vm308_vm0, %v307_v0 }
  0x1a   :  { %279 = vmatmul.mubr.msk.bf16.gmra.mrb[8].mxu0 %vm65_vm1, %v304_v5 }
  0xdd   :  { %v109_v9 = vpop.f32.mrb[0].mxu0 }
  0xde   :  { %v110_v10 = vadd.f32 %v241_v8, %v109_v9  ;;  %v272_v11 = vpop.f32.mrb[1].mxu0 }
  0xdf   :  { %v112_v12 = vpop.f32.mrb[2].mxu0 }
  0xe0   :  { %v113_v13 = vadd.f32 %v241_v8, %v112_v12  ;;  %v273_v14 = vpop.f32.mrb[3].mxu0  ;;  %v132_v15 = vmax.f32 %v110_v10, 0.0 }
  0xe2   :  { %v133_v16 = vmax.f32 %v113_v13, 0.0 }
  0xe4   :  { %v138_v17 = vpack.c.bf16 %v133_v16, %v132_v15 }
  0xe5   :  { %v117_v18 = vpop.f32.mrb[4].mxu0 }
  0xe6   :  { %v118_v19 = vadd.f32 %v241_v8, %v117_v18  ;;  %v276_v20 = vpop.f32.mrb[5].mxu0  ;;  %287 = vmatmul.mubr.msk.bf16.vlgmr.msra.gmra.mrb[0].mxu1 %vm65_vm1, %v138_v17 }
  0xe7   :  { %v120_v21 = vpop.f32.mrb[6].mxu0  ;;  %290 = vmatprep.mubr.msk.bf16.mxu1 %vm308_vm0, %v307_v0 }
  0xe8   :  { %v121_v22 = vadd.f32 %v241_v8, %v120_v21  ;;  %v277_v23 = vpop.f32.mrb[7].mxu0  ;;  %v134_v24 = vmax.f32 %v118_v19, 0.0 }
  0xea   :  { %v135_v25 = vmax.f32 %v121_v22, 0.0 }
  0xec   :  { %v139_v26 = vpack.c.bf16 %v135_v25, %v134_v24 }
  0xed   :  { %v125_v27 = vpop.f32.mrb[8].mxu0 }
  0xee   :  { %v126_v28 = vadd.f32 %v241_v8, %v125_v27  ;;  %v280_v29 = vpop.f32.mrb[9].mxu0  ;;  %291 = vmatmul.mubr.msk.bf16.gmra.mrb[4].mxu1 %vm65_vm1, %v139_v26 }
  0xef   :  { %v128_v30 = vpop.f32.mrb[10].mxu0  ;;  %294 = vmatprep.mubr.msk.bf16.mxu1 %vm308_vm0, %v307_v0 }
  0xf0   :  { %v129_v31 = vadd.f32 %v241_v8, %v128_v30  ;;  %v281_v32 = vpop.f32.mrb[11].mxu0  ;;  %v136_v33 = vmax.f32 %v126_v28, 0.0 }
  0xf2   :  { %v137_v34 = vmax.f32 %v129_v31, 0.0 }
  0xf4   :  { %v140_v35 = vpack.c.bf16 %v137_v34, %v136_v33 }
  0xf6   :  { %295 = vmatmul.mubr.msk.bf16.gmra.mrb[8].mxu1 %vm65_vm1, %v140_v35 }
 0x1b9   :  { %v207_v37 = vpop.f32.mrb[0].mxu1 }
 0x1ba   :  { %v208_v38 = vadd.f32 %v250_v36, %v207_v37  ;;  %v288_v39 = vpop.f32.mrb[1].mxu1 }
 0x1bb   :  { %v210_v40 = vpop.f32.mrb[2].mxu1 }
 0x1bc   :  { %231 = vst.msk [vmem:[%s407_s5] sm:$0xff] %vm230_vm2, %v208_v38  ;;  %v211_v41 = vadd.f32 %v250_v36, %v210_v40  ;;  %v289_v42 = vpop.f32.mrb[3].mxu1 }
 0x1be   :  { %232 = vst.msk [vmem:[%s407_s5 + $0x8] sm:$0xff] %vm230_vm2, %v211_v41 }
 0x1c1   :  { %v215_v43 = vpop.f32.mrb[4].mxu1 }
 0x1c2   :  { %v216_v44 = vadd.f32 %v250_v36, %v215_v43  ;;  %v292_v45 = vpop.f32.mrb[5].mxu1 }
 0x1c3   :  { %v218_v46 = vpop.f32.mrb[6].mxu1 }
 0x1c4   :  { %233 = vst.msk [vmem:[%s407_s5 + $0x10] sm:$0xff] %vm230_vm2, %v216_v44  ;;  %v219_v47 = vadd.f32 %v250_v36, %v218_v46  ;;  %v293_v48 = vpop.f32.mrb[7].mxu1 }
 0x1c6   :  { %234 = vst.msk [vmem:[%s407_s5 + $0x18] sm:$0xff] %vm230_vm2, %v219_v47 }
 0x1c9   :  { %v223_v49 = vpop.f32.mrb[8].mxu1 }
 0x1ca   :  { %v224_v50 = vadd.f32 %v250_v36, %v223_v49  ;;  %v296_v51 = vpop.f32.mrb[9].mxu1 }
 0x1cb   :  { %v226_v52 = vpop.f32.mrb[10].mxu1 }
 0x1cc   :  { %235 = vst.msk [vmem:[%s407_s5 + $0x20] sm:$0xff] %vm230_vm2, %v224_v50  ;;  %v227_v53 = vadd.f32 %v250_v36, %v226_v52  ;;  %v297_v54 = vpop.f32.mrb[11].mxu1 }
 0x1ce   :  { %236 = vst.msk [vmem:[%s407_s5 + $0x28] sm:$0xff] %vm230_vm2, %v227_v53 }

// kernel: tpu_custom_call.1
= control target key start
LH: loop header
LB: loop body
LE: loop exit
PB: predicated region body
PF: predicated region fallthrough
CT: control target
= control target key end

     0   :  { %v307_v0 = vmov 0.0   ;;  %vm308_vm0 = vmmov 0   ;;  %vm65_vm1 = vcmask 261120   ;;  %vm230_vm2 = vcmask 130048   ;;  %s402_s1 = inlined_call_operand.vmem [shape: bf16[32,32], index: 1, kind: input, shape index: {}]   ;;  %s403_s0 = inlined_call_operand.vmem [shape: bf16[48,32], index: 0, kind: input, shape index: {}]   ;;  %s404_s3 = inlined_call_operand.vmem [shape: bf16[32,16], index: 3, kind: input, shape index: {}]   ;;  %s405_s2 = inlined_call_operand.vmem [shape: f32[1,32], index: 2, kind: input, shape index: {}]   ;;  %s406_s4 = inlined_call_operand.vmem [shape: f32[1,16], index: 4, kind: input, shape index: {}]   ;;  %s407_s5 = inlined_call_operand.vmem [shape: f32[48,16], index: 5, kind: output, shape index: {}]  }
   0x1   :  { %266 = vmatprep.subr.bf16.mxu0 %v307_v0  ;;  %v300_v1 = vld [vmem:[%s402_s1] sm:$0xff]   ;;  %270 = vmatprep.mubr.msk.bf16.mxu0 %vm308_vm0, %v307_v0  ;;  %v301_v2 = vld [vmem:[%s402_s1 + $0x8] sm:$0xff]   ;;  %v304_v5 = vld [vmem:[%s403_s0 + $0x10] sm:$0xff]  }
   0x2   :  { %282 = vmatprep.subr.bf16.mxu1 %v307_v0  ;;  %286 = vmatprep.mubr.msk.bf16.mxu1 %vm308_vm0, %v307_v0  ;;  %v302_v3 = vld [vmem:[%s403_s0] sm:$0xff]   ;;  %v303_v4 = vld [vmem:[%s403_s0 + $0x8] sm:$0xff]  }
   0x3   :  { %267 = vmatpush3.bf16.msra.mxu0 %v300_v1  ;;  %v305_v6 = vld [vmem:[%s404_s3] sm:$0xff]   ;;  %v306_v7 = vld [vmem:[%s404_s3 + $0x8] sm:$0xff]  }
   0x4   :  { %268 = vmatprep.subr.bf16.mxu0 %v307_v0  ;;  %283 = vmatpush3.bf16.msra.mxu1 %v305_v6  ;;  %v241_v8 = vld [vmem:[%s405_s2] ss:$0 sm:$0xff] }
   0x5   :  { %284 = vmatprep.subr.bf16.mxu1 %v307_v0  ;;  %v250_v36 = vld [vmem:[%s406_s4] ss:$0 sm:$0xff] }
   0x7   :  { %269 = vmatpush3.bf16.msra.mxu0 %v301_v2 }
   0x8   :  { %285 = vmatpush3.bf16.msra.mxu1 %v306_v7 }
   0xa   :  { %271 = vmatmul.mubr.msk.bf16.vlgmr.msra.gmra.mrb[0].mxu0 %vm65_vm1, %v302_v3 }
   0xb   :  { %274 = vmatprep.mubr.msk.bf16.mxu0 %vm308_vm0, %v307_v0 }
  0x12   :  { %275 = vmatmul.mubr.msk.bf16.gmra.mrb[4].mxu0 %vm65_vm1, %v303_v4 }
  0x13   :  { %278 = vmatprep.mubr.msk.bf16.mxu0 %vm308_vm0, %v307_v0 }
  0x1a   :  { %279 = vmatmul.mubr.msk.bf16.gmra.mrb[8].mxu0 %vm65_vm1, %v304_v5 }
  0xdd   :  { %v109_v9 = vpop.f32.mrb[0].mxu0 }
  0xde   :  { %v110_v10 = vadd.f32 %v241_v8, %v109_v9  ;;  %v272_v11 = vpop.f32.mrb[1].mxu0 }
  0xdf   :  { %v112_v12 = vpop.f32.mrb[2].mxu0 }
  0xe0   :  { %v113_v13 = vadd.f32 %v241_v8, %v112_v12  ;;  %v273_v14 = vpop.f32.mrb[3].mxu0  ;;  %v132_v15 = vmax.f32 %v110_v10, 0.0 }
  0xe2   :  { %v133_v16 = vmax.f32 %v113_v13, 0.0 }
  0xe4   :  { %v138_v17 = vpack.c.bf16 %v133_v16, %v132_v15 }
  0xe5   :  { %v117_v18 = vpop.f32.mrb[4].mxu0 }
  0xe6   :  { %v118_v19 = vadd.f32 %v241_v8, %v117_v18  ;;  %v276_v20 = vpop.f32.mrb[5].mxu0  ;;  %287 = vmatmul.mubr.msk.bf16.vlgmr.msra.gmra.mrb[0].mxu1 %vm65_vm1, %v138_v17 }
  0xe7   :  { %v120_v21 = vpop.f32.mrb[6].mxu0  ;;  %290 = vmatprep.mubr.msk.bf16.mxu1 %vm308_vm0, %v307_v0 }
  0xe8   :  { %v121_v22 = vadd.f32 %v241_v8, %v120_v21  ;;  %v277_v23 = vpop.f32.mrb[7].mxu0  ;;  %v134_v24 = vmax.f32 %v118_v19, 0.0 }
  0xea   :  { %v135_v25 = vmax.f32 %v121_v22, 0.0 }
  0xec   :  { %v139_v26 = vpack.c.bf16 %v135_v25, %v134_v24 }
  0xed   :  { %v125_v27 = vpop.f32.mrb[8].mxu0 }
  0xee   :  { %v126_v28 = vadd.f32 %v241_v8, %v125_v27  ;;  %v280_v29 = vpop.f32.mrb[9].mxu0  ;;  %291 = vmatmul.mubr.msk.bf16.gmra.mrb[4].mxu1 %vm65_vm1, %v139_v26 }
  0xef   :  { %v128_v30 = vpop.f32.mrb[10].mxu0  ;;  %294 = vmatprep.mubr.msk.bf16.mxu1 %vm308_vm0, %v307_v0 }
  0xf0   :  { %v129_v31 = vadd.f32 %v241_v8, %v128_v30  ;;  %v281_v32 = vpop.f32.mrb[11].mxu0  ;;  %v136_v33 = vmax.f32 %v126_v28, 0.0 }
  0xf2   :  { %v137_v34 = vmax.f32 %v129_v31, 0.0 }
  0xf4   :  { %v140_v35 = vpack.c.bf16 %v137_v34, %v136_v33 }
  0xf6   :  { %295 = vmatmul.mubr.msk.bf16.gmra.mrb[8].mxu1 %vm65_vm1, %v140_v35 }
 0x1b9   :  { %v207_v37 = vpop.f32.mrb[0].mxu1 }
 0x1ba   :  { %v208_v38 = vadd.f32 %v250_v36, %v207_v37  ;;  %v288_v39 = vpop.f32.mrb[1].mxu1 }
 0x1bb   :  { %v210_v40 = vpop.f32.mrb[2].mxu1 }
 0x1bc   :  { %231 = vst.msk [vmem:[%s407_s5] sm:$0xff] %vm230_vm2, %v208_v38  ;;  %v211_v41 = vadd.f32 %v250_v36, %v210_v40  ;;  %v289_v42 = vpop.f32.mrb[3].mxu1 }
 0x1be   :  { %232 = vst.msk [vmem:[%s407_s5 + $0x8] sm:$0xff] %vm230_vm2, %v211_v41 }
 0x1c1   :  { %v215_v43 = vpop.f32.mrb[4].mxu1 }
 0x1c2   :  { %v216_v44 = vadd.f32 %v250_v36, %v215_v43  ;;  %v292_v45 = vpop.f32.mrb[5].mxu1 }
 0x1c3   :  { %v218_v46 = vpop.f32.mrb[6].mxu1 }
 0x1c4   :  { %233 = vst.msk [vmem:[%s407_s5 + $0x10] sm:$0xff] %vm230_vm2, %v216_v44  ;;  %v219_v47 = vadd.f32 %v250_v36, %v218_v46  ;;  %v293_v48 = vpop.f32.mrb[7].mxu1 }
 0x1c6   :  { %234 = vst.msk [vmem:[%s407_s5 + $0x18] sm:$0xff] %vm230_vm2, %v219_v47 }
 0x1c9   :  { %v223_v49 = vpop.f32.mrb[8].mxu1 }
 0x1ca   :  { %v224_v50 = vadd.f32 %v250_v36, %v223_v49  ;;  %v296_v51 = vpop.f32.mrb[9].mxu1 }
 0x1cb   :  { %v226_v52 = vpop.f32.mrb[10].mxu1 }
 0x1cc   :  { %235 = vst.msk [vmem:[%s407_s5 + $0x20] sm:$0xff] %vm230_vm2, %v224_v50  ;;  %v227_v53 = vadd.f32 %v250_v36, %v226_v52  ;;  %v297_v54 = vpop.f32.mrb[11].mxu1 }
 0x1ce   :  { %236 = vst.msk [vmem:[%s407_s5 + $0x28] sm:$0xff] %vm230_vm2, %v227_v53 }

</bundles_post_ra>
